<compile_context>
chip_gen: v6e
topology: v6e:2x2x1
jax: 0.10.0
libtpu: 0.0.40
codegen_flags: <defaults>
</compile_context>

<pallas_src>
import functools

import jax
import jax.numpy as jnp
from jax.experimental import pallas as pl
from jax.experimental.pallas import tpu as pltpu


def _round_up(x, m):
    return ((x + m - 1) // m) * m


# ---------------------------------------------------------------------------
# Pallas kernels
# ---------------------------------------------------------------------------
def _matmul_kernel(a_ref, b_ref, o_ref):
    # Whole-K matmul (tk == Kp): one MXU dot per (i, j) tile written straight
    # to the f32 output block. No K grid axis, no acc scratch, no pl.when.
    o_ref[...] = jnp.dot(a_ref[...], b_ref[...],
                         preferred_element_type=jnp.float32)


def _bn_stats_kernel(y_ref, stats_ref):
    # Pass 1: per-channel sum / sum-of-squares, accumulated across the M grid
    # axis (output block index is constant -> resident accumulator).
    @pl.when(pl.program_id(0) == 0)
    def _():
        stats_ref[...] = jnp.zeros_like(stats_ref)

    y = y_ref[...]                                      # (tm, Np) f32
    s = jnp.sum(y, axis=0, keepdims=True)               # (1, Np)
    sq = jnp.sum(y * y, axis=0, keepdims=True)          # (1, Np)
    stats_ref[...] += jnp.concatenate([s, sq], axis=0)  # rows: [sum, sumsq]


def _bn_apply_kernel(y_ref, stats_ref, gamma_ref, beta_ref, o_ref, *,
                     eps, act, inv_count):
    # Pass 2: normalize + affine (+ ReLU). Per-channel scale/shift recomputed
    # per tile from the tiny (2, Np) stats block (negligible VPU work).
    mean = stats_ref[0:1, :] * inv_count
    var = jnp.maximum(stats_ref[1:2, :] * inv_count - mean * mean, 0.0)
    scale = gamma_ref[...] * jax.lax.rsqrt(var + eps)
    shift = beta_ref[...] - mean * scale
    y = y_ref[...] * scale + shift
    if act:
        y = jnp.maximum(y, 0.0)
    o_ref[...] = y.astype(o_ref.dtype)


# ---------------------------------------------------------------------------
# Pallas wrappers
# ---------------------------------------------------------------------------
_VMEM_LIMIT = 32 * 1024 * 1024  # safe on v5e (16 MiB default scoped) and v7x (64 MiB phys)


def pallas_conv_matmul(a_bf16, b_bf16, *, tm_target=512, tn_target=256):
    """A[M,K]@B[K,N] on the MXU. bf16 inputs, f32 output, padded to (Mp, Np)."""
    M, K = a_bf16.shape
    K2, N = b_bf16.shape
    assert K == K2
    Kp = _round_up(K, 128)
    Np = _round_up(N, 128)
    tm = min(tm_target, _round_up(M, 8))
    Mp = _round_up(M, tm)
    tn = min(tn_target, Np)

    a_p = jnp.pad(a_bf16, ((0, Mp - M), (0, Kp - K)))
    b_p = jnp.pad(b_bf16, ((0, Kp - K), (0, Np - N)))

    cost = pl.CostEstimate(
        flops=2 * Mp * Kp * Np,
        transcendentals=0,
        bytes_accessed=a_p.size * 2 + b_p.size * 2 + Mp * Np * 4,
    )

    y_p = pl.pallas_call(
        _matmul_kernel,
        out_shape=jax.ShapeDtypeStruct((Mp, Np), jnp.float32),
        grid_spec=pltpu.PrefetchScalarGridSpec(
            num_scalar_prefetch=0,
            grid=(Mp // tm, Np // tn),
            in_specs=[
                pl.BlockSpec((tm, Kp), lambda i, j: (i, 0)),
                pl.BlockSpec((Kp, tn), lambda i, j: (0, j)),
            ],
            out_specs=pl.BlockSpec((tm, tn), lambda i, j: (i, j)),
        ),
        compiler_params=pltpu.CompilerParams(
            dimension_semantics=("parallel", "parallel"),
            vmem_limit_bytes=_VMEM_LIMIT,
        ),
        cost_estimate=cost,
    )(a_p, b_p)
    return y_p, tm


def pallas_bn_relu(y_p, gamma_p, beta_p, *, count, eps, act, tm):
    """Train-mode BatchNorm2d (+ReLU) over (Mp, Np), statistics over `count` rows."""
    Mp, Np = y_p.shape
    assert Mp % tm == 0
    grid_m = Mp // tm

    # Pass 1: per-channel sum & sumsq (padded rows/channels are exactly zero).
    stats = pl.pallas_call(
        _bn_stats_kernel,
        out_shape=jax.ShapeDtypeStruct((2, Np), jnp.float32),
        grid_spec=pltpu.PrefetchScalarGridSpec(
            num_scalar_prefetch=0,
            grid=(grid_m,),
            in_specs=[pl.BlockSpec((tm, Np), lambda i: (i, 0))],
            out_specs=pl.BlockSpec((2, Np), lambda i: (0, 0)),
        ),
        compiler_params=pltpu.CompilerParams(
            dimension_semantics=("arbitrary",),
            vmem_limit_bytes=_VMEM_LIMIT,
        ),
    )(y_p)

    # Pass 2: normalize + affine + ReLU, tiled & parallel over M (megacore).
    kernel = functools.partial(
        _bn_apply_kernel, eps=eps, act=act, inv_count=1.0 / float(count)
    )
    out = pl.pallas_call(
        kernel,
        out_shape=jax.ShapeDtypeStruct((Mp, Np), jnp.float32),
        grid_spec=pltpu.PrefetchScalarGridSpec(
            num_scalar_prefetch=0,
            grid=(grid_m,),
            in_specs=[
                pl.BlockSpec((tm, Np), lambda i: (i, 0)),
                pl.BlockSpec((2, Np), lambda i: (0, 0)),
                pl.BlockSpec((1, Np), lambda i: (0, 0)),
                pl.BlockSpec((1, Np), lambda i: (0, 0)),
            ],
            out_specs=pl.BlockSpec((tm, Np), lambda i: (i, 0)),
        ),
        compiler_params=pltpu.CompilerParams(
            dimension_semantics=("parallel",),
            vmem_limit_bytes=_VMEM_LIMIT,
        ),
    )(y_p, stats, gamma_p, beta_p)
    return out


# ---------------------------------------------------------------------------
# JAX glue (layout plumbing only)
# ---------------------------------------------------------------------------
def _im2col(x, k, stride, padding, dilation):
    """x: NCHW -> A[M, K] with M = N*Ho*Wo, K = C*k*k (index = c*k*k + kh*k + kw)."""
    N, C, H, W = x.shape
    x_pad = jnp.pad(x, ((0, 0), (0, 0), (padding, padding), (padding, padding)))
    Hp, Wp = H + 2 * padding, W + 2 * padding
    Ho = (Hp - dilation * (k - 1) - 1) // stride + 1
    Wo = (Wp - dilation * (k - 1) - 1) // stride + 1

    patches = []
    for kh in range(k):
        for kw in range(k):
            h0 = kh * dilation
            w0 = kw * dilation
            patches.append(
                x_pad[
                    :,
                    :,
                    h0 : h0 + stride * (Ho - 1) + 1 : stride,
                    w0 : w0 + stride * (Wo - 1) + 1 : stride,
                ]
            )  # (N, C, Ho, Wo)
    p = jnp.stack(patches, axis=2)                # (N, C, k*k, Ho, Wo)
    p = p.reshape(N, C * k * k, Ho, Wo)           # K index = c*k*k + kh*k + kw
    A = p.transpose(0, 2, 3, 1).reshape(N * Ho * Wo, C * k * k)
    return A, Ho, Wo


def conv2d_bn_relu(x, weight, gamma, beta, *, kernel_size=7, stride=2,
                   padding=3, dilation=1, eps=1e-5, act=True):
    """Forward equivalent of the PyTorch Conv2D module. x: NCHW, returns NCHW f32."""
    N, C, H, W = x.shape
    out_c = weight.shape[0]

    # im2col emitted directly in bf16 (halves A's HBM traffic; MXU is bf16-native).
    # TODO(synk): for full fusion, move patch extraction into the matmul kernel
    #             via (kh,kw) 'arbitrary' grid axes over a padded NHWC input.
    A, Ho, Wo = _im2col(x.astype(jnp.bfloat16), kernel_size, stride, padding, dilation)
    Bw = weight.reshape(out_c, C * kernel_size * kernel_size).T.astype(jnp.bfloat16)
    M = N * Ho * Wo

    # Conv hot path: single-pass MXU matmul (tk == full K), f32 out, padded lanes.
    y_p, tm = pallas_conv_matmul(A, Bw)           # (Mp, Np) f32
    Np = y_p.shape[1]

    # BatchNorm (train-mode batch stats) + ReLU, tiled, channels kept lane-dense.
    gamma_p = jnp.pad(gamma.astype(jnp.float32), (0, Np - out_c),
                      constant_values=1.0).reshape(1, Np)
    beta_p = jnp.pad(beta.astype(jnp.float32), (0, Np - out_c)).reshape(1, Np)
    y_p = pallas_bn_relu(y_p, gamma_p, beta_p, count=M, eps=eps, act=act, tm=tm)

    # single slice + transpose back to NCHW at the very end
    y = y_p[:M, :out_c].reshape(N, Ho, Wo, out_c).transpose(0, 3, 1, 2)
    return y


if __name__ == "__main__":
    key = jax.random.PRNGKey(0)
    k_x, k_w = jax.random.split(key)

    in_c, out_c = 4, 8
    x = jax.random.normal(k_x, (2, in_c, 16, 16), dtype=jnp.float32)

    # Deterministic parameter init (Conv2d weight; BN gamma=1, beta=0 as in PyTorch)
    weight = 0.1 * jax.random.normal(k_w, (out_c, in_c, 7, 7), dtype=jnp.float32)
    gamma = jnp.ones((out_c,), dtype=jnp.float32)
    beta = jnp.zeros((out_c,), dtype=jnp.float32)

    y = conv2d_bn_relu(x, weight, gamma, beta,
                       kernel_size=7, stride=2, padding=3, dilation=1, act=True)
    y = jax.block_until_ready(y)
    assert y.shape == (2, out_c, 8, 8), y.shape
    print("KERNEL_OK")
</pallas_src>

<mosaic_0001>
module attributes {stable_mosaic.version = 11 : i64} {
  func.func @_matmul_kernel(%arg0: i32, %arg1: i32, %arg2: memref<128x256xbf16, #tpu.memory_space<vmem>>, %arg3: memref<256x128xbf16, #tpu.memory_space<vmem>>, %arg4: memref<128x128xf32, #tpu.memory_space<vmem>>) attributes {dimension_semantics = [#tpu.dimension_semantics<parallel>, #tpu.dimension_semantics<parallel>], iteration_bounds = array<i64: 1, 1>, scalar_prefetch = 0 : i64, scratch_operands = 0 : i64, tpu.core_type = #tpu.core_type<tc>, window_params = [{transform_indices = @transform_0, window_bounds = array<i64: 128, 256>}, {transform_indices = @transform_1, window_bounds = array<i64: 256, 128>}, {transform_indices = @transform_2, window_bounds = array<i64: 128, 128>}]} {
    %c0 = arith.constant 0 : index
    %c0_0 = arith.constant 0 : index
    %0 = vector.load %arg2[%c0, %c0_0] : memref<128x256xbf16, #tpu.memory_space<vmem>>, vector<128x256xbf16>
    %c0_1 = arith.constant 0 : index
    %c0_2 = arith.constant 0 : index
    %1 = vector.load %arg3[%c0_1, %c0_2] : memref<256x128xbf16, #tpu.memory_space<vmem>>, vector<256x128xbf16>
    %cst = arith.constant dense<0.000000e+00> : vector<128x128xf32>
    %2 = tpu.matmul %0, %1, %cst {dimension_numbers = #tpu.dot_dimension_numbers<[1], [0], [0], [1], [0, 0, 1, 1], [], []>} : vector<128x256xbf16>, vector<256x128xbf16>, vector<128x128xf32> -> vector<128x128xf32>
    %c0_3 = arith.constant 0 : index
    %c0_4 = arith.constant 0 : index
    %3 = vector.load %arg4[%c0_3, %c0_4] : memref<128x128xf32, #tpu.memory_space<vmem>>, vector<128x128xf32>
    tpu.vector_store %arg4[%c0_3, %c0_4], %2 {strides = array<i32>} : memref<128x128xf32, #tpu.memory_space<vmem>>, vector<128x128xf32>,
    return
  }
  func.func @transform_0(%arg0: i32, %arg1: i32) -> (i32, i32) {
    %c0_i32 = arith.constant 0 : i32
    %c0_i32_0 = arith.constant 0 : i32
    return %arg0, %c0_i32 : i32, i32
  }
  func.func @transform_1(%arg0: i32, %arg1: i32) -> (i32, i32) {
    %c0_i32 = arith.constant 0 : i32
    %c0_i32_0 = arith.constant 0 : i32
    return %c0_i32, %arg1 : i32, i32
  }
  func.func @transform_2(%arg0: i32, %arg1: i32) -> (i32, i32) {
    %c0_i32 = arith.constant 0 : i32
    return %arg0, %arg1 : i32, i32
  }
}

</mosaic_0001>

<bundles_post_ra>
// kernel: tpu_custom_call.1
= control target key start
LH: loop header
LB: loop body
LE: loop exit
PB: predicated region body
PF: predicated region fallthrough
CT: control target
= control target key end

     0   :  { %7 = vsyncpa [#allocation3], 0  ;;  %s658_s0 = inlined_call_operand.hbm [shape: bf16[128,256], index: 0, kind: input, shape index: {}]   ;;  %s659_s1 = inlined_call_operand.hbm [shape: bf16[256,128], index: 1, kind: input, shape index: {}]   ;;  %s660_s2 = inlined_call_operand.hbm [shape: f32[128,128], index: 2, kind: output, shape index: {}]  }
   0x1   :  { %8 = vsyncpa [#allocation6], 0 }
   0x2   :  { %9 = vsyncpa [#allocation4], 0  ;;  %s621_s9 = smov [#allocation2]  }
   0x3   :  { %s15_s10 = sshll.u32 %s621_s9, 4  ;;  %s16_s10 = int_to_ptr.vmem [resolvable:$true] %s15_s10 }
   0x4   :  { %s563_s11 = scalar_lea.vmem %s16_s10, 2048  ;;  %p568_p1 = scmp.lt.s32.totalorder %s16_s10, %s16_s10 }
   0x5   :  { %p564_p0 = scmp.ne.s32.totalorder %s16_s10, %s563_s11  ;;  %p569_p2 = scmp.lt.s32.totalorder %s563_s11, %s563_s11 }
   0x7   :  { %p570_p3 = por %p569_p2, %p568_p1 }
   0x9   :  { %p571_p4 = pnand %p570_p3, %p564_p0 }
   0xb   :  { %574 = shalt.err (!%p571_p4)
}
   0xc   :  { %s622_s12 = smov 128   ;;  %s623_s13 = smov 8  }
   0xd   :  { %21 = dma.hbm_to_vmem [thread:$0]  %s658_s0, 2048, %s16_s10, [#allocation3], %s622_s12, %s622_s12, %s623_s13  }
   0xe   :  { %s624_s16 = smov [#allocation5]  }
   0xf   :  { %s27_s17 = sshll.u32 %s624_s16, 4  ;;  %s28_s17 = int_to_ptr.vmem [resolvable:$true] %s27_s17 }
  0x10   :  { %s583_s18 = scalar_lea.vmem %s28_s17, 2048  ;;  %p588_p6 = scmp.lt.s32.totalorder %s28_s17, %s28_s17 }
  0x11   :  { %p584_p5 = scmp.ne.s32.totalorder %s28_s17, %s583_s18  ;;  %p589_p7 = scmp.lt.s32.totalorder %s583_s18, %s583_s18 }
  0x13   :  { %p590_p8 = por %p589_p7, %p588_p6 }
  0x15   :  { %p591_p9 = pnand %p590_p8, %p584_p5 }
  0x17   :  { %594 = shalt.err (!%p591_p9)
}
  0x18   :  { %s625_s19 = smov 64   ;;  %s626_s20 = smov 4  }
  0x19   :  { %33 = dma.hbm_to_vmem [thread:$0]  %s659_s1, 2048, %s28_s17, [#allocation6], %s625_s19, %s625_s19, %s626_s20  }
  0x1a   :  { %615 = dma.done.wait [#allocation3], 2048  }
  0x1b   :  { %616 = vsyncadd [#allocation3], 4294965248 }
  0x1c   :  { %617 = dma.done.wait [#allocation6], 2048  }
  0x1d   :  { %618 = vsyncadd [#allocation6], 4294965248  ;;  %v515_v0 = vld [vmem:[#allocation5 + $0x78] sm:$0xff]   ;;  %v517_v2 = vld [vmem:[#allocation5 + $0x70] sm:$0xff]   ;;  %s627_s0 = smov [#allocation7]  }
  0x1e   :  { %v516_v1 = vld [vmem:[#allocation5 + $0x38] sm:$0xff]   ;;  %428 = vmatprep.subr.bf16.mxu0 %v515_v0  ;;  %492 = vmatprep.subr.bf16.mxu1 %v515_v0  ;;  %v518_v3 = vld [vmem:[#allocation5 + $0x30] sm:$0xff]   ;;  %v519_v4 = vld [vmem:[#allocation5 + $0x68] sm:$0xff]   ;;  %s383_s1 = sshll.u32 %s627_s0, 4  ;;  %s384_s1 = int_to_ptr.vmem [resolvable:$true] %s383_s1 }
  0x1f   :  { %429 = vmatpush3.bf16.msra.mxu0 %v516_v1  ;;  %500 = vmatpush3.bf16.msra.mxu1 %v516_v1  ;;  %v520_v5 = vld [vmem:[#allocation5 + $0x28] sm:$0xff]   ;;  %v521_v6 = vld [vmem:[#allocation5 + $0x60] sm:$0xff]   ;;  %v523_v8 = vld [vmem:[#allocation5 + $0x58] sm:$0xff]   ;;  %s595_s23 = scalar_lea.vmem %s384_s1, 2048  ;;  %p600_p11 = scmp.lt.s32.totalorder %s384_s1, %s384_s1 }
  0x20   :  { %430 = vmatprep.subr.bf16.mxu0 %v517_v2  ;;  %493 = vmatprep.subr.bf16.mxu1 %v517_v2  ;;  %v522_v7 = vld [vmem:[#allocation5 + $0x20] sm:$0xff]   ;;  %v524_v9 = vld [vmem:[#allocation5 + $0x18] sm:$0xff]   ;;  %v525_v10 = vld [vmem:[#allocation5 + $0x50] sm:$0xff]   ;;  %p596_p10 = scmp.ne.s32.totalorder %s384_s1, %s595_s23  ;;  %p601_p12 = scmp.lt.s32.totalorder %s595_s23, %s595_s23 }
  0x21   :  { %v533_v11 = vld [vmem:[#allocation2 + $0x4] ss:$8 sps:$4 sm:$0xff]   ;;  %v526_v13 = vld [vmem:[#allocation5 + $0x10] sm:$0xff]   ;;  %v531_v18 = vld [vmem:[#allocation2] ss:$8 sps:$4 sm:$0xff]  }
  0x22   :  { %v536_v12 = vld [vmem:[#allocation2 + $0x44] ss:$8 sps:$4 sm:$0xff]   ;;  %297 = vmatprep.mubr.bf16.mxu0 %v533_v11  ;;  %v534_v19 = vld [vmem:[#allocation2 + $0x40] ss:$8 sps:$4 sm:$0xff]   ;;  %v537_v20 = vld [vmem:[#allocation2 + $0x14] ss:$8 sps:$4 sm:$0xff]   ;;  %p602_p13 = por %p601_p12, %p600_p11 }
  0x23   :  { %431 = vmatpush3.bf16.msra.mxu0 %v518_v3  ;;  %501 = vmatpush3.bf16.msra.mxu1 %v518_v3  ;;  %v527_v14 = vld [vmem:[#allocation5 + $0x48] sm:$0xff]   ;;  %v529_v16 = vld [vmem:[#allocation5 + $0x40] sm:$0xff]   ;;  %v539_v21 = vld [vmem:[#allocation2 + $0x54] ss:$8 sps:$4 sm:$0xff]  }
  0x24   :  { %432 = vmatprep.subr.bf16.mxu0 %v519_v4  ;;  %494 = vmatprep.subr.bf16.mxu1 %v519_v4  ;;  %v528_v15 = vld [vmem:[#allocation5 + $0x8] sm:$0xff]   ;;  %v530_v17 = vld [vmem:[#allocation5] sm:$0xff]   ;;  %v541_v22 = vld [vmem:[#allocation2 + $0x10] ss:$8 sps:$4 sm:$0xff]   ;;  %p603_p0 = pnand %p602_p13, %p596_p10 }
  0x25   :  { %329 = vmatprep.mubr.bf16.mxu1 %v536_v12  ;;  %v542_v23 = vld [vmem:[#allocation2 + $0x50] ss:$8 sps:$4 sm:$0xff]   ;;  %v543_v24 = vld [vmem:[#allocation2 + $0x24] ss:$8 sps:$4 sm:$0xff]   ;;  %v547_v26 = vld [vmem:[#allocation2 + $0x20] ss:$8 sps:$4 sm:$0xff]  }
  0x26   :  { %v545_v25 = vld [vmem:[#allocation2 + $0x64] ss:$8 sps:$4 sm:$0xff]   ;;  %v548_v27 = vld [vmem:[#allocation2 + $0x60] ss:$8 sps:$4 sm:$0xff]   ;;  %v549_v28 = vld [vmem:[#allocation2 + $0x34] ss:$8 sps:$4 sm:$0xff]  }
  0x27   :  { %433 = vmatpush3.bf16.msra.mxu0 %v520_v5  ;;  %502 = vmatpush3.bf16.msra.mxu1 %v520_v5  ;;  %v551_v29 = vld [vmem:[#allocation2 + $0x74] ss:$8 sps:$4 sm:$0xff]   ;;  %v553_v30 = vld [vmem:[#allocation2 + $0x30] ss:$8 sps:$4 sm:$0xff]  }
  0x28   :  { %434 = vmatprep.subr.bf16.mxu0 %v521_v6  ;;  %495 = vmatprep.subr.bf16.mxu1 %v521_v6  ;;  %v554_v31 = vld [vmem:[#allocation2 + $0x70] ss:$8 sps:$4 sm:$0xff]  }
  0x2b   :  { %435 = vmatpush3.bf16.msra.mxu0 %v522_v7  ;;  %503 = vmatpush3.bf16.msra.mxu1 %v522_v7 }
  0x2c   :  { %436 = vmatprep.subr.bf16.mxu0 %v523_v8  ;;  %496 = vmatprep.subr.bf16.mxu1 %v523_v8 }
  0x2f   :  { %437 = vmatpush3.bf16.msra.mxu0 %v524_v9  ;;  %504 = vmatpush3.bf16.msra.mxu1 %v524_v9 }
  0x30   :  { %438 = vmatprep.subr.bf16.mxu0 %v525_v10  ;;  %497 = vmatprep.subr.bf16.mxu1 %v525_v10 }
  0x33   :  { %439 = vmatpush3.bf16.msra.mxu0 %v526_v13  ;;  %505 = vmatpush3.bf16.msra.mxu1 %v526_v13 }
  0x34   :  { %440 = vmatprep.subr.bf16.mxu0 %v527_v14  ;;  %498 = vmatprep.subr.bf16.mxu1 %v527_v14 }
  0x37   :  { %441 = vmatpush3.bf16.msra.mxu0 %v528_v15  ;;  %506 = vmatpush3.bf16.msra.mxu1 %v528_v15 }
  0x38   :  { %442 = vmatprep.subr.bf16.mxu0 %v529_v16  ;;  %499 = vmatprep.subr.bf16.mxu1 %v529_v16 }
  0x3b   :  { %443 = vmatpush3.bf16.msra.mxu0 %v530_v17  ;;  %507 = vmatpush3.bf16.msra.mxu1 %v530_v17 }
  0x3e   :  { %298 = vmatmul.mubr.bf16.vlgmr.msra.gmra.mxu0 %v531_v18  ;;  %330 = vmatmul.mubr.bf16.vlgmr.msra.gmra.mxu1 %v534_v19 }
  0x3f   :  { %305 = vmatprep.mubr.bf16.mxu0 %v537_v20  ;;  %337 = vmatprep.mubr.bf16.mxu1 %v539_v21 }
  0x46   :  { %306 = vmatmul.mubr.bf16.gmra.mxu0 %v541_v22  ;;  %338 = vmatmul.mubr.bf16.gmra.mxu1 %v542_v23 }
  0x47   :  { %313 = vmatprep.mubr.bf16.mxu0 %v543_v24  ;;  %345 = vmatprep.mubr.bf16.mxu1 %v545_v25 }
  0x4e   :  { %314 = vmatmul.mubr.bf16.gmra.mxu0 %v547_v26  ;;  %346 = vmatmul.mubr.bf16.gmra.mxu1 %v548_v27 }
  0x4f   :  { %321 = vmatprep.mubr.bf16.mxu0 %v549_v28  ;;  %353 = vmatprep.mubr.bf16.mxu1 %v551_v29 }
  0x56   :  { %322 = vmatmul.mubr.bf16.gmra.mxu0 %v553_v30  ;;  %354 = vmatmul.mubr.bf16.gmra.mxu1 %v554_v31 }
  0xfe   :  { %v444_v32 = vpop.f32.mrf.mxu0  ;;  %v468_v33 = vpop.f32.mrf.mxu1 }
 0x100   :  { %v445_v34 = vpop.f32.mrf.mxu0  ;;  %v469_v35 = vpop.f32.mrf.mxu1 }
 0x101   :  { %v446_v36 = vadd.f32 %v445_v34, %v444_v32  ;;  %v470_v37 = vadd.f32 %v469_v35, %v468_v33 }
 0x102   :  { %v447_v38 = vpop.f32.mrf.mxu0  ;;  %v471_v39 = vpop.f32.mrf.mxu1 }
 0x103   :  { %362 = vst [vmem:[#allocation7] sm:$0xff] %v446_v36  ;;  %370 = vst [vmem:[#allocation7 + $0x40] sm:$0xff] %v470_v37 }
 0x104   :  { %v448_v40 = vpop.f32.mrf.mxu0  ;;  %v472_v41 = vpop.f32.mrf.mxu1 }
 0x105   :  { %v449_v42 = vadd.f32 %v448_v40, %v447_v38  ;;  %v473_v43 = vadd.f32 %v472_v41, %v471_v39 }
 0x106   :  { %v450_v44 = vpop.f32.mrf.mxu0  ;;  %v474_v45 = vpop.f32.mrf.mxu1 }
 0x107   :  { %363 = vst [vmem:[#allocation7 + $0x8] sm:$0xff] %v449_v42  ;;  %371 = vst [vmem:[#allocation7 + $0x48] sm:$0xff] %v473_v43 }
 0x108   :  { %v451_v46 = vpop.f32.mrf.mxu0  ;;  %v475_v47 = vpop.f32.mrf.mxu1 }
 0x109   :  { %v452_v48 = vadd.f32 %v451_v46, %v450_v44  ;;  %v476_v49 = vadd.f32 %v475_v47, %v474_v45 }
 0x10a   :  { %v453_v50 = vpop.f32.mrf.mxu0  ;;  %v477_v51 = vpop.f32.mrf.mxu1 }
 0x10b   :  { %364 = vst [vmem:[#allocation7 + $0x10] sm:$0xff] %v452_v48  ;;  %372 = vst [vmem:[#allocation7 + $0x50] sm:$0xff] %v476_v49 }
 0x10c   :  { %v454_v52 = vpop.f32.mrf.mxu0  ;;  %v478_v53 = vpop.f32.mrf.mxu1 }
 0x10d   :  { %v455_v54 = vadd.f32 %v454_v52, %v453_v50  ;;  %v479_v55 = vadd.f32 %v478_v53, %v477_v51 }
 0x10e   :  { %v456_v56 = vpop.f32.mrf.mxu0  ;;  %v480_v57 = vpop.f32.mrf.mxu1 }
 0x10f   :  { %365 = vst [vmem:[#allocation7 + $0x18] sm:$0xff] %v455_v54  ;;  %373 = vst [vmem:[#allocation7 + $0x58] sm:$0xff] %v479_v55 }
 0x110   :  { %v457_v58 = vpop.f32.mrf.mxu0  ;;  %v481_v59 = vpop.f32.mrf.mxu1 }
 0x111   :  { %v458_v60 = vadd.f32 %v457_v58, %v456_v56  ;;  %v482_v61 = vadd.f32 %v481_v59, %v480_v57 }
 0x112   :  { %v459_v62 = vpop.f32.mrf.mxu0  ;;  %v483_v63 = vpop.f32.mrf.mxu1 }
 0x113   :  { %366 = vst [vmem:[#allocation7 + $0x20] sm:$0xff] %v458_v60  ;;  %374 = vst [vmem:[#allocation7 + $0x60] sm:$0xff] %v482_v61 }
 0x114   :  { %v460_v0 = vpop.f32.mrf.mxu0  ;;  %v484_v1 = vpop.f32.mrf.mxu1 }
 0x115   :  { %v461_v2 = vadd.f32 %v460_v0, %v459_v62  ;;  %v485_v3 = vadd.f32 %v484_v1, %v483_v63 }
 0x116   :  { %v462_v4 = vpop.f32.mrf.mxu0  ;;  %v486_v5 = vpop.f32.mrf.mxu1 }
 0x117   :  { %367 = vst [vmem:[#allocation7 + $0x28] sm:$0xff] %v461_v2  ;;  %375 = vst [vmem:[#allocation7 + $0x68] sm:$0xff] %v485_v3 }
 0x118   :  { %v463_v6 = vpop.f32.mrf.mxu0  ;;  %v487_v7 = vpop.f32.mrf.mxu1 }
 0x119   :  { %v464_v8 = vadd.f32 %v463_v6, %v462_v4  ;;  %v488_v9 = vadd.f32 %v487_v7, %v486_v5 }
 0x11a   :  { %v465_v10 = vpop.f32.mrf.mxu0  ;;  %v489_v11 = vpop.f32.mrf.mxu1 }
 0x11b   :  { %368 = vst [vmem:[#allocation7 + $0x30] sm:$0xff] %v464_v8  ;;  %376 = vst [vmem:[#allocation7 + $0x70] sm:$0xff] %v488_v9 }
 0x11c   :  { %v466_v12 = vpop.f32.mrf.mxu0  ;;  %v490_v13 = vpop.f32.mrf.mxu1 }
 0x11d   :  { %v467_v14 = vadd.f32 %v466_v12, %v465_v10  ;;  %v491_v15 = vadd.f32 %v490_v13, %v489_v11 }
 0x11f   :  { %369 = vst [vmem:[#allocation7 + $0x38] sm:$0xff] %v467_v14  ;;  %377 = vst [vmem:[#allocation7 + $0x78] sm:$0xff] %v491_v15 }
 0x120   :  { %606 = shalt.err (!%p603_p0)
}
 0x121   :  { %389 = dma.vmem_to_hbm [thread:$0]  %s384_s1, 2048, %s660_s2, [#allocation4], %s622_s12, %s622_s12, %s623_s13  }
 0x122   :  { %619 = dma.done.wait [#allocation4], 2048  }
 0x123   :  { %620 = vsyncadd [#allocation4], 4294965248 }
 0x124   :  { %393 = vsyncpa [#allocation3], 1 }
 0x125   :  { %394 = vsyncpa [#allocation6], 1 }
 0x126   :  { %395 = vsyncpa [#allocation4], 1 }

</bundles_post_ra>
